<compile_context>
chip_gen: v7x
topology: tpu7x:2x2x1
jax: 0.10.0
libtpu: 0.0.40
codegen_flags: <defaults>
</compile_context>

<pallas_src>
import jax
import jax.numpy as jnp
from jax.experimental import pallas as pl
from jax.experimental.pallas import tpu as pltpu

LANE = 128


def _round_up(x, m):
    return (x + m - 1) // m * m


def _vmem_cap_bytes():
    """Usable per-core VMEM (physical minus ~1/8 headroom for compiler scratch)."""
    try:
        phys = int(pltpu.get_tpu_info().vmem_capacity_bytes)
    except Exception:
        phys = 64 << 20  # conservative fallback: v7x per-TensorCore VMEM
    return phys - phys // 8


def mlp3_kernel(x_ref, w1_ref, b1_ref, w2_ref, b2_ref, w3_ref, b3_ref, o_ref):
    # Layer 1: [tb, in] @ [in, h1] + [1, h1], fp32 accumulation on the MXU.
    h1 = jnp.dot(x_ref[...], w1_ref[...],
                 preferred_element_type=jnp.float32) + b1_ref[...]
    # Layers 2/3: cast activations to the matmul dtype (bf16 fast path is an
    # intentional deviation from exact fp32 PyTorch semantics), acc in fp32.
    h2 = jnp.dot(h1.astype(w2_ref.dtype), w2_ref[...],
                 preferred_element_type=jnp.float32) + b2_ref[...]
    out = jnp.dot(h2.astype(w3_ref.dtype), w3_ref[...],
                  preferred_element_type=jnp.float32) + b3_ref[...]
    o_ref[...] = out.astype(o_ref.dtype)


def prepare_params(w1, b1, w2, b2, w3, b3, *, matmul_dtype=jnp.bfloat16):
    """One-time parameter prep (hoisted out of the forward pass).

    Accepts PyTorch nn.Linear layout: w [out_features, in_features], b [out].
    Returns params laid out as [in, out] (so the kernel computes x @ W + b),
    with only the final output lane dim zero-padded to a multiple of 128.
    """
    out_dim = int(w3.shape[0])
    out_p = _round_up(out_dim, LANE)

    def wt(w):
        return jnp.asarray(w).T.astype(matmul_dtype)

    def bias(b, width=None):
        b = jnp.asarray(b, jnp.float32).reshape(1, -1)
        if width is not None and width > b.shape[1]:
            b = jnp.pad(b, ((0, 0), (0, width - b.shape[1])))
        return b

    w3_t = wt(w3)
    w3_p = jnp.pad(w3_t, ((0, 0), (0, out_p - w3_t.shape[1])))
    params = (wt(w1), bias(b1), wt(w2), bias(b2), w3_p, bias(b3, out_p))
    return params, out_dim


def mlp3_forward(x, params, out_dim, *, block_batch=512):
    """Fused 3-layer MLP forward. `params` comes from prepare_params."""
    w1_p, b1_p, w2_p, b2_p, w3_p, b3_p = params
    batch, in_dim = x.shape
    h1_dim = w1_p.shape[1]
    h2_dim = w2_p.shape[1]
    out_p = w3_p.shape[1]

    mm_dtype = jnp.dtype(w1_p.dtype)
    itemsize = mm_dtype.itemsize
    # Sublane tile: 8 for fp32, 16 for bf16 (packed along sublanes).
    sub = 16 if mm_dtype == jnp.dtype(jnp.bfloat16) else 8

    cap = _vmem_cap_bytes()

    batch_sub = _round_up(batch, sub)
    tb = min(_round_up(block_batch, sub), batch_sub)
    # v7x megacore: guarantee >=2 grid steps when the batch splits cleanly.
    if batch_sub // tb < 2 and batch_sub >= 2 * sub and (batch_sub // 2) % sub == 0:
        tb = batch_sub // 2

    resident_bytes = sum(int(a.size) * a.dtype.itemsize
                         for a in (w1_p, b1_p, w2_p, b2_p, w3_p, b3_p))

    def vmem_need(tb_):
        # resident params x1 (single-buffered), x/out tiles x2, intermediates x1
        tiles = 2 * tb_ * (_round_up(in_dim, LANE) * itemsize + out_p * 4)
        interm = tb_ * (_round_up(h1_dim, LANE) + _round_up(h2_dim, LANE) + out_p) * 4
        return resident_bytes + tiles + interm

    while vmem_need(tb) > cap and tb > sub:
        tb = max(sub, (tb // 2) // sub * sub)

    batch_p = _round_up(batch, tb)
    grid = (batch_p // tb,)

    x_p = x.astype(mm_dtype)
    if batch_p > batch:
        x_p = jnp.pad(x_p, ((0, batch_p - batch), (0, 0)))

    vmem_limit = int(min(cap, max(32 << 20, int(vmem_need(tb) * 1.25))))

    flops = 2 * batch_p * (in_dim * h1_dim + h1_dim * h2_dim + h2_dim * out_p)
    bytes_accessed = (int(x_p.size) * itemsize + resident_bytes
                      + batch_p * out_p * 4)

    def _call(single_buffer_weights):
        def resident(a):
            if single_buffer_weights:
                # Constant block index -> fetched once, no second buffer needed.
                return pl.BlockSpec(a.shape, lambda i: (0, 0),
                                    pipeline_mode=pl.Buffered(1))
            return pl.BlockSpec(a.shape, lambda i: (0, 0))

        return pl.pallas_call(
            mlp3_kernel,
            out_shape=jax.ShapeDtypeStruct((batch_p, out_p), jnp.float32),
            grid=grid,
            in_specs=[
                pl.BlockSpec((tb, in_dim), lambda i: (i, 0)),   # x: batch-tiled
                resident(w1_p), resident(b1_p),
                resident(w2_p), resident(b2_p),
                resident(w3_p), resident(b3_p),
            ],
            out_specs=pl.BlockSpec((tb, out_p), lambda i: (i, 0)),
            compiler_params=pltpu.CompilerParams(
                dimension_semantics=("parallel",),
                vmem_limit_bytes=vmem_limit,
            ),
            cost_estimate=pl.CostEstimate(
                flops=flops, bytes_accessed=bytes_accessed, transcendentals=0),
        )(x_p, w1_p, b1_p, w2_p, b2_p, w3_p, b3_p)

    try:
        out_padded = _call(True)
    except Exception:
        # Fallback if pipeline_mode=pl.Buffered(1) is unsupported in this
        # Pallas version; default double-buffering is still correct.
        out_padded = _call(False)

    # Slice off batch + output-lane padding.
    return out_padded[:batch, :out_dim]


if __name__ == "__main__":
    # Small shapes consistent with the module: in=32, h1=64, h2=48, out=16.
    batch, in_dim, hidden_dim1, hidden_dim2, out_dim = 8, 32, 64, 48, 16

    key = jax.random.PRNGKey(0)
    kx, k1w, k1b, k2w, k2b, k3w, k3b = jax.random.split(key, 7)

    def init_linear(kw, kb, in_features, out_features):
        """PyTorch nn.Linear default init; weight in PyTorch layout [out, in]."""
        bound = 1.0 / jnp.sqrt(jnp.float32(in_features))
        w = jax.random.uniform(kw, (out_features, in_features), jnp.float32,
                               minval=-bound, maxval=bound)
        b = jax.random.uniform(kb, (out_features,), jnp.float32,
                               minval=-bound, maxval=bound)
        return w, b

    x = jax.random.normal(kx, (batch, in_dim), jnp.float32)
    w1, b1 = init_linear(k1w, k1b, in_dim, hidden_dim1)
    w2, b2 = init_linear(k2w, k2b, hidden_dim1, hidden_dim2)
    w3, b3 = init_linear(k3w, k3b, hidden_dim2, out_dim)

    # Reference: PyTorch forward semantics (x @ W.T + b per layer).
    ref = ((x @ w1.T + b1) @ w2.T + b2) @ w3.T + b3

    # Exact-parity fp32 path.
    params_f32, od = prepare_params(w1, b1, w2, b2, w3, b3,
                                    matmul_dtype=jnp.float32)
    out_f32 = jax.block_until_ready(mlp3_forward(x, params_f32, od))
    assert out_f32.shape == (batch, out_dim)
    assert jnp.allclose(out_f32, ref, atol=1e-5, rtol=1e-5)

    # Default fast path: bf16 MXU inputs, fp32 accumulation / bias / output.
    params_bf16, od = prepare_params(w1, b1, w2, b2, w3, b3)  # bf16 default
    out_bf16 = jax.block_until_ready(mlp3_forward(x, params_bf16, od))
    assert out_bf16.shape == (batch, out_dim)
    assert jnp.allclose(out_bf16, ref, atol=5e-2, rtol=5e-2)

    print("KERNEL_OK")
</pallas_src>

<mosaic_0001>
module attributes {stable_mosaic.version = 11 : i64} {
  func.func @mlp3_kernel(%arg0: i32, %arg1: memref<8x32xf32, #tpu.memory_space<vmem>>, %arg2: memref<32x64xf32, #tpu.memory_space<vmem>>, %arg3: memref<1x64xf32, #tpu.memory_space<vmem>>, %arg4: memref<64x48xf32, #tpu.memory_space<vmem>>, %arg5: memref<1x48xf32, #tpu.memory_space<vmem>>, %arg6: memref<48x128xf32, #tpu.memory_space<vmem>>, %arg7: memref<1x128xf32, #tpu.memory_space<vmem>>, %arg8: memref<8x128xf32, #tpu.memory_space<vmem>>) attributes {dimension_semantics = [#tpu.dimension_semantics<parallel>], iteration_bounds = array<i64: 1>, scalar_prefetch = 0 : i64, scratch_operands = 0 : i64, tpu.core_type = #tpu.core_type<tc>, window_params = [{transform_indices = @transform_0, window_bounds = array<i64: 8, 32>}, {pipeline_mode = #tpu.pipeline_mode<synchronous>, transform_indices = @transform_1, window_bounds = array<i64: 32, 64>}, {pipeline_mode = #tpu.pipeline_mode<synchronous>, transform_indices = @transform_2, window_bounds = array<i64: 1, 64>}, {pipeline_mode = #tpu.pipeline_mode<synchronous>, transform_indices = @transform_3, window_bounds = array<i64: 64, 48>}, {pipeline_mode = #tpu.pipeline_mode<synchronous>, transform_indices = @transform_4, window_bounds = array<i64: 1, 48>}, {pipeline_mode = #tpu.pipeline_mode<synchronous>, transform_indices = @transform_5, window_bounds = array<i64: 48, 128>}, {pipeline_mode = #tpu.pipeline_mode<synchronous>, transform_indices = @transform_6, window_bounds = array<i64: 1, 128>}, {transform_indices = @transform_7, window_bounds = array<i64: 8, 128>}]} {
    %c0 = arith.constant 0 : index
    %c0_0 = arith.constant 0 : index
    %0 = vector.load %arg1[%c0, %c0_0] : memref<8x32xf32, #tpu.memory_space<vmem>>, vector<8x32xf32>
    %c0_1 = arith.constant 0 : index
    %c0_2 = arith.constant 0 : index
    %1 = vector.load %arg2[%c0_1, %c0_2] : memref<32x64xf32, #tpu.memory_space<vmem>>, vector<32x64xf32>
    %cst = arith.constant dense<0.000000e+00> : vector<8x64xf32>
    %2 = tpu.matmul %0, %1, %cst {dimension_numbers = #tpu.dot_dimension_numbers<[1], [0], [0], [1], [0, 0, 1, 1], [], []>} : vector<8x32xf32>, vector<32x64xf32>, vector<8x64xf32> -> vector<8x64xf32>
    %c0_3 = arith.constant 0 : index
    %c0_4 = arith.constant 0 : index
    %3 = vector.load %arg3[%c0_3, %c0_4] : memref<1x64xf32, #tpu.memory_space<vmem>>, vector<1x64xf32>
    %4 = vector.broadcast %3 : vector<1x64xf32> to vector<8x64xf32>
    %5 = arith.addf %2, %4 : vector<8x64xf32>
    %c0_5 = arith.constant 0 : index
    %c0_6 = arith.constant 0 : index
    %6 = vector.load %arg4[%c0_5, %c0_6] : memref<64x48xf32, #tpu.memory_space<vmem>>, vector<64x48xf32>
    %cst_7 = arith.constant dense<0.000000e+00> : vector<8x48xf32>
    %7 = tpu.matmul %5, %6, %cst_7 {dimension_numbers = #tpu.dot_dimension_numbers<[1], [0], [0], [1], [0, 0, 1, 1], [], []>} : vector<8x64xf32>, vector<64x48xf32>, vector<8x48xf32> -> vector<8x48xf32>
    %c0_8 = arith.constant 0 : index
    %c0_9 = arith.constant 0 : index
    %8 = vector.load %arg5[%c0_8, %c0_9] : memref<1x48xf32, #tpu.memory_space<vmem>>, vector<1x48xf32>
    %9 = vector.broadcast %8 : vector<1x48xf32> to vector<8x48xf32>
    %10 = arith.addf %7, %9 : vector<8x48xf32>
    %c0_10 = arith.constant 0 : index
    %c0_11 = arith.constant 0 : index
    %11 = vector.load %arg6[%c0_10, %c0_11] : memref<48x128xf32, #tpu.memory_space<vmem>>, vector<48x128xf32>
    %cst_12 = arith.constant dense<0.000000e+00> : vector<8x128xf32>
    %12 = tpu.matmul %10, %11, %cst_12 {dimension_numbers = #tpu.dot_dimension_numbers<[1], [0], [0], [1], [0, 0, 1, 1], [], []>} : vector<8x48xf32>, vector<48x128xf32>, vector<8x128xf32> -> vector<8x128xf32>
    %c0_13 = arith.constant 0 : index
    %c0_14 = arith.constant 0 : index
    %13 = vector.load %arg7[%c0_13, %c0_14] : memref<1x128xf32, #tpu.memory_space<vmem>>, vector<1x128xf32>
    %14 = vector.broadcast %13 : vector<1x128xf32> to vector<8x128xf32>
    %15 = arith.addf %12, %14 : vector<8x128xf32>
    %c0_15 = arith.constant 0 : index
    %c0_16 = arith.constant 0 : index
    %16 = vector.load %arg8[%c0_15, %c0_16] : memref<8x128xf32, #tpu.memory_space<vmem>>, vector<8x128xf32>
    tpu.vector_store %arg8[%c0_15, %c0_16], %15 {strides = array<i32>} : memref<8x128xf32, #tpu.memory_space<vmem>>, vector<8x128xf32>,
    return
  }
  func.func @transform_0(%arg0: i32) -> (i32, i32) {
    %c0_i32 = arith.constant 0 : i32
    %c0_i32_0 = arith.constant 0 : i32
    return %arg0, %c0_i32 : i32, i32
  }
  func.func @transform_1(%arg0: i32) -> (i32, i32) {
    %c0_i32 = arith.constant 0 : i32
    %c0_i32_0 = arith.constant 0 : i32
    %c0_i32_1 = arith.constant 0 : i32
    return %c0_i32, %c0_i32_0 : i32, i32
  }
  func.func @transform_2(%arg0: i32) -> (i32, i32) {
    %c0_i32 = arith.constant 0 : i32
    %c0_i32_0 = arith.constant 0 : i32
    %c0_i32_1 = arith.constant 0 : i32
    return %c0_i32, %c0_i32_0 : i32, i32
  }
  func.func @transform_3(%arg0: i32) -> (i32, i32) {
    %c0_i32 = arith.constant 0 : i32
    %c0_i32_0 = arith.constant 0 : i32
    %c0_i32_1 = arith.constant 0 : i32
    return %c0_i32, %c0_i32_0 : i32, i32
  }
  func.func @transform_4(%arg0: i32) -> (i32, i32) {
    %c0_i32 = arith.constant 0 : i32
    %c0_i32_0 = arith.constant 0 : i32
    %c0_i32_1 = arith.constant 0 : i32
    return %c0_i32, %c0_i32_0 : i32, i32
  }
  func.func @transform_5(%arg0: i32) -> (i32, i32) {
    %c0_i32 = arith.constant 0 : i32
    %c0_i32_0 = arith.constant 0 : i32
    %c0_i32_1 = arith.constant 0 : i32
    return %c0_i32, %c0_i32_0 : i32, i32
  }
  func.func @transform_6(%arg0: i32) -> (i32, i32) {
    %c0_i32 = arith.constant 0 : i32
    %c0_i32_0 = arith.constant 0 : i32
    %c0_i32_1 = arith.constant 0 : i32
    return %c0_i32, %c0_i32_0 : i32, i32
  }
  func.func @transform_7(%arg0: i32) -> (i32, i32) {
    %c0_i32 = arith.constant 0 : i32
    %c0_i32_0 = arith.constant 0 : i32
    return %arg0, %c0_i32 : i32, i32
  }
}

module attributes {stable_mosaic.version = 11 : i64} {
  func.func @mlp3_kernel(%arg0: i32, %arg1: memref<8x32xf32, #tpu.memory_space<vmem>>, %arg2: memref<32x64xf32, #tpu.memory_space<vmem>>, %arg3: memref<1x64xf32, #tpu.memory_space<vmem>>, %arg4: memref<64x48xf32, #tpu.memory_space<vmem>>, %arg5: memref<1x48xf32, #tpu.memory_space<vmem>>, %arg6: memref<48x128xf32, #tpu.memory_space<vmem>>, %arg7: memref<1x128xf32, #tpu.memory_space<vmem>>, %arg8: memref<8x128xf32, #tpu.memory_space<vmem>>) attributes {dimension_semantics = [#tpu.dimension_semantics<parallel>], iteration_bounds = array<i64: 1>, scalar_prefetch = 0 : i64, scratch_operands = 0 : i64, tpu.core_type = #tpu.core_type<tc>, window_params = [{transform_indices = @transform_0, window_bounds = array<i64: 8, 32>}, {pipeline_mode = #tpu.pipeline_mode<synchronous>, transform_indices = @transform_1, window_bounds = array<i64: 32, 64>}, {pipeline_mode = #tpu.pipeline_mode<synchronous>, transform_indices = @transform_2, window_bounds = array<i64: 1, 64>}, {pipeline_mode = #tpu.pipeline_mode<synchronous>, transform_indices = @transform_3, window_bounds = array<i64: 64, 48>}, {pipeline_mode = #tpu.pipeline_mode<synchronous>, transform_indices = @transform_4, window_bounds = array<i64: 1, 48>}, {pipeline_mode = #tpu.pipeline_mode<synchronous>, transform_indices = @transform_5, window_bounds = array<i64: 48, 128>}, {pipeline_mode = #tpu.pipeline_mode<synchronous>, transform_indices = @transform_6, window_bounds = array<i64: 1, 128>}, {transform_indices = @transform_7, window_bounds = array<i64: 8, 128>}]} {
    %c0 = arith.constant 0 : index
    %c0_0 = arith.constant 0 : index
    %0 = vector.load %arg1[%c0, %c0_0] : memref<8x32xf32, #tpu.memory_space<vmem>>, vector<8x32xf32>
    %c0_1 = arith.constant 0 : index
    %c0_2 = arith.constant 0 : index
    %1 = vector.load %arg2[%c0_1, %c0_2] : memref<32x64xf32, #tpu.memory_space<vmem>>, vector<32x64xf32>
    %cst = arith.constant dense<0.000000e+00> : vector<8x64xf32>
    %2 = tpu.matmul %0, %1, %cst {dimension_numbers = #tpu.dot_dimension_numbers<[1], [0], [0], [1], [0, 0, 1, 1], [], []>} : vector<8x32xf32>, vector<32x64xf32>, vector<8x64xf32> -> vector<8x64xf32>
    %c0_3 = arith.constant 0 : index
    %c0_4 = arith.constant 0 : index
    %3 = vector.load %arg3[%c0_3, %c0_4] : memref<1x64xf32, #tpu.memory_space<vmem>>, vector<1x64xf32>
    %4 = vector.broadcast %3 : vector<1x64xf32> to vector<8x64xf32>
    %5 = arith.addf %2, %4 : vector<8x64xf32>
    %c0_5 = arith.constant 0 : index
    %c0_6 = arith.constant 0 : index
    %6 = vector.load %arg4[%c0_5, %c0_6] : memref<64x48xf32, #tpu.memory_space<vmem>>, vector<64x48xf32>
    %cst_7 = arith.constant dense<0.000000e+00> : vector<8x48xf32>
    %7 = tpu.matmul %5, %6, %cst_7 {dimension_numbers = #tpu.dot_dimension_numbers<[1], [0], [0], [1], [0, 0, 1, 1], [], []>} : vector<8x64xf32>, vector<64x48xf32>, vector<8x48xf32> -> vector<8x48xf32>
    %c0_8 = arith.constant 0 : index
    %c0_9 = arith.constant 0 : index
    %8 = vector.load %arg5[%c0_8, %c0_9] : memref<1x48xf32, #tpu.memory_space<vmem>>, vector<1x48xf32>
    %9 = vector.broadcast %8 : vector<1x48xf32> to vector<8x48xf32>
    %10 = arith.addf %7, %9 : vector<8x48xf32>
    %c0_10 = arith.constant 0 : index
    %c0_11 = arith.constant 0 : index
    %11 = vector.load %arg6[%c0_10, %c0_11] : memref<48x128xf32, #tpu.memory_space<vmem>>, vector<48x128xf32>
    %cst_12 = arith.constant dense<0.000000e+00> : vector<8x128xf32>
    %12 = tpu.matmul %10, %11, %cst_12 {dimension_numbers = #tpu.dot_dimension_numbers<[1], [0], [0], [1], [0, 0, 1, 1], [], []>} : vector<8x48xf32>, vector<48x128xf32>, vector<8x128xf32> -> vector<8x128xf32>
    %c0_13 = arith.constant 0 : index
    %c0_14 = arith.constant 0 : index
    %13 = vector.load %arg7[%c0_13, %c0_14] : memref<1x128xf32, #tpu.memory_space<vmem>>, vector<1x128xf32>
    %14 = vector.broadcast %13 : vector<1x128xf32> to vector<8x128xf32>
    %15 = arith.addf %12, %14 : vector<8x128xf32>
    %c0_15 = arith.constant 0 : index
    %c0_16 = arith.constant 0 : index
    %16 = vector.load %arg8[%c0_15, %c0_16] : memref<8x128xf32, #tpu.memory_space<vmem>>, vector<8x128xf32>
    tpu.vector_store %arg8[%c0_15, %c0_16], %15 {strides = array<i32>} : memref<8x128xf32, #tpu.memory_space<vmem>>, vector<8x128xf32>,
    return
  }
  func.func @transform_0(%arg0: i32) -> (i32, i32) {
    %c0_i32 = arith.constant 0 : i32
    %c0_i32_0 = arith.constant 0 : i32
    return %arg0, %c0_i32 : i32, i32
  }
  func.func @transform_1(%arg0: i32) -> (i32, i32) {
    %c0_i32 = arith.constant 0 : i32
    %c0_i32_0 = arith.constant 0 : i32
    %c0_i32_1 = arith.constant 0 : i32
    return %c0_i32, %c0_i32_0 : i32, i32
  }
  func.func @transform_2(%arg0: i32) -> (i32, i32) {
    %c0_i32 = arith.constant 0 : i32
    %c0_i32_0 = arith.constant 0 : i32
    %c0_i32_1 = arith.constant 0 : i32
    return %c0_i32, %c0_i32_0 : i32, i32
  }
  func.func @transform_3(%arg0: i32) -> (i32, i32) {
    %c0_i32 = arith.constant 0 : i32
    %c0_i32_0 = arith.constant 0 : i32
    %c0_i32_1 = arith.constant 0 : i32
    return %c0_i32, %c0_i32_0 : i32, i32
  }
  func.func @transform_4(%arg0: i32) -> (i32, i32) {
    %c0_i32 = arith.constant 0 : i32
    %c0_i32_0 = arith.constant 0 : i32
    %c0_i32_1 = arith.constant 0 : i32
    return %c0_i32, %c0_i32_0 : i32, i32
  }
  func.func @transform_5(%arg0: i32) -> (i32, i32) {
    %c0_i32 = arith.constant 0 : i32
    %c0_i32_0 = arith.constant 0 : i32
    %c0_i32_1 = arith.constant 0 : i32
    return %c0_i32, %c0_i32_0 : i32, i32
  }
  func.func @transform_6(%arg0: i32) -> (i32, i32) {
    %c0_i32 = arith.constant 0 : i32
    %c0_i32_0 = arith.constant 0 : i32
    %c0_i32_1 = arith.constant 0 : i32
    return %c0_i32, %c0_i32_0 : i32, i32
  }
  func.func @transform_7(%arg0: i32) -> (i32, i32) {
    %c0_i32 = arith.constant 0 : i32
    %c0_i32_0 = arith.constant 0 : i32
    return %arg0, %c0_i32 : i32, i32
  }
}

</mosaic_0001>

<bundles_post_ra>
// kernel: tpu_custom_call.1
= control target key start
LH: loop header
LB: loop body
LE: loop exit
PB: predicated region body
PF: predicated region fallthrough
CT: control target
= control target key end

     0   :  { %v431_v3 = vmov 0.0|0.0   ;;  %vm432_vm0 = vmmov 0   ;;  %v433_v6 = vmov 0.0   ;;  %s556_s0 = inlined_call_operand.vmem [shape: f32[8,32], index: 0, kind: input, shape index: {}]   ;;  %s557_s1 = inlined_call_operand.vmem [shape: f32[32,64], index: 1, kind: input, shape index: {}]   ;;  %s558_s2 = inlined_call_operand.vmem [shape: f32[1,64], index: 2, kind: input, shape index: {}]   ;;  %s559_s3 = inlined_call_operand.vmem [shape: f32[64,48], index: 3, kind: input, shape index: {}]   ;;  %s560_s4 = inlined_call_operand.vmem [shape: f32[1,48], index: 4, kind: input, shape index: {}]   ;;  %s561_s5 = inlined_call_operand.vmem [shape: f32[48,128], index: 5, kind: input, shape index: {}]   ;;  %s562_s6 = inlined_call_operand.vmem [shape: f32[1,128], index: 6, kind: input, shape index: {}]   ;;  %s563_s7 = inlined_call_operand.hbm [shape: f32[8,128], index: 7, kind: output, shape index: {}]  }
   0x1   :  { %v28_v0 = vld [vmem:[%s557_s1] sm:$0xff]  ;;  %v29_v1 = vld [vmem:[%s557_s1 + $0x8] sm:$0xff]  ;;  %v30_v2 = vld [vmem:[%s557_s1 + $0x10] sm:$0xff]  ;;  %376 = vmatprep.subr.bf16.mxu0 %v431_v3  ;;  %339 = vmatprep.mubr.msk.f32.mxu0 %vm432_vm0, %v433_v6 }
   0x2   :  { %v377_v4 = vpack.c.bf16 %v29_v1, %v28_v0  ;;  %v31_v5 = vld [vmem:[%s557_s1 + $0x18] sm:$0xff]  ;;  %v113_v7 = vld [vmem:[%s559_s3] sm:$0xff]  ;;  %382 = vmatprep.subr.bf16.mxu1 %v431_v3  ;;  %v114_v8 = vld [vmem:[%s559_s3 + $0x8] sm:$0xff]  ;;  %358 = vmatprep.mubr.msk.f32.mxu1 %vm432_vm0, %v433_v6 }
   0x3   :  { %v115_v9 = vld [vmem:[%s559_s3 + $0x10] sm:$0xff]  ;;  %v116_v10 = vld [vmem:[%s559_s3 + $0x18] sm:$0xff]  ;;  %v380_v11 = vpack.c.bf16 %v31_v5, %v30_v2  ;;  %v383_v12 = vpack.c.bf16 %v114_v8, %v113_v7 }
   0x4   :  { %378 = vmatpush3.bf16.msra.mxu0 %v377_v4 }
   0x5   :  { %379 = vmatprep.subr.bf16.mxu0 %v431_v3 }
   0x6   :  { %12 = vsyncpa [#allocation3], 0  ;;  %384 = vmatpush3.bf16.msra.mxu1 %v383_v12  ;;  %v386_v13 = vpack.c.bf16 %v116_v10, %v115_v9  ;;  %v117_v14 = vld [vmem:[%s559_s3 + $0x20] sm:$0xff]  ;;  %v118_v15 = vld [vmem:[%s559_s3 + $0x28] sm:$0xff]  ;;  %vm39_vm1 = vcmask 261120   ;;  %vm128_vm2 = vcmask 523264  }
   0x7   :  { %385 = vmatprep.subr.bf16.mxu1 %v431_v3  ;;  %v27_v16 = vld [vmem:[%s556_s0] sm:$0xff]  ;;  %v389_v17 = vpack.c.bf16 %v118_v15, %v117_v14  ;;  %v119_v18 = vld [vmem:[%s559_s3 + $0x30] sm:$0xff]  ;;  %v120_v19 = vld [vmem:[%s559_s3 + $0x38] sm:$0xff]  ;;  %vm215_vm3 = vcmask 392192   ;;  %s434_s17 = smov [#allocation2]  }
   0x8   :  { %381 = vmatpush3.bf16.msra.mxu0 %v380_v11  ;;  %v392_v20 = vpack.c.bf16 %v120_v19, %v119_v18  ;;  %v202_v21 = vld [vmem:[%s561_s5] sm:$0xff]  ;;  %v203_v22 = vld [vmem:[%s561_s5 + $0x8] sm:$0xff]  ;;  %v204_v23 = vld [vmem:[%s561_s5 + $0x10] sm:$0xff]  ;;  %s296_s18 = sshll.u32 %s434_s17, 4  ;;  %s297_s18 = int_to_ptr.vmem [resolvable:$true] %s296_s18 }
   0x9   :  { %394 = vmatprep.subr.bf16.mxu0 %v431_v3  ;;  %v395_v24 = vpack.c.bf16 %v203_v22, %v202_v21  ;;  %v205_v25 = vld [vmem:[%s561_s5 + $0x18] sm:$0xff]  ;;  %v304_v27 = vld [vmem:[%s558_s2] ss:$0 sm:$0xff]  ;;  %v207_v32 = vld [vmem:[%s561_s5 + $0x28] sm:$0xff]  ;;  %p412_p1 = scmp.lt.s32.totalorder %s297_s18, %s297_s18 }
   0xa   :  { %387 = vmatpush3.bf16.msra.mxu1 %v386_v13  ;;  %v398_v26 = vpack.c.bf16 %v205_v25, %v204_v23  ;;  %v206_v31 = vld [vmem:[%s561_s5 + $0x20] sm:$0xff]  ;;  %s407_s5 = scalar_lea.vmem %s297_s18, 128 }
   0xb   :  { %340 = vmatmul.mubr.msk.f32.vlgmr.msra.gmra.mrb[0].mxu0 %vm39_vm1, %v27_v16  ;;  %388 = vmatprep.subr.bf16.mxu1 %v431_v3  ;;  %v401_v33 = vpack.c.bf16 %v207_v32, %v206_v31  ;;  %v306_v34 = vld [vmem:[%s560_s4] ss:$0 sm:$0xff]  ;;  %p408_p0 = scmp.ne.s32.totalorder %s297_s18, %s407_s5  ;;  %p413_p2 = scmp.lt.s32.totalorder %s407_s5, %s407_s5 }
   0xc   :  { %373 = vmatprep.mubr.msk.f32.mxu0 %vm432_vm0, %v433_v6  ;;  %396 = vmatpush3.bf16.msra.mxu0 %v395_v24  ;;  %v308_v38 = vld [vmem:[%s562_s6] ss:$0 sm:$0xff] }
   0xd   :  { %397 = vmatprep.subr.bf16.mxu0 %v431_v3  ;;  %p414_p3 = por %p413_p2, %p412_p1 }
   0xe   :  { %390 = vmatpush3.bf16.msra.mxu1 %v389_v17 }
   0xf   :  { %391 = vmatprep.subr.bf16.mxu1 %v431_v3  ;;  %p415_p4 = pnand %p414_p3, %p408_p0 }
  0x10   :  { %399 = vmatpush3.bf16.msra.mxu0 %v398_v26 }
  0x11   :  { %400 = vmatprep.subr.bf16.mxu0 %v431_v3 }
  0x12   :  { %393 = vmatpush3.bf16.msra.mxu1 %v392_v20 }
  0x14   :  { %402 = vmatpush3.bf16.msra.mxu0 %v401_v33 }
  0xde   :  { %v109_v28 = vpop.f32.mrb[0].mxu0 }
  0xdf   :  { %v110_v29 = vadd.f32 %v304_v27, %v109_v28  ;;  %v341_v30 = vpop.f32.mrb[1].mxu0 }
  0xe1   :  { %359 = vmatmul.mubr.msk.f32.vlgmr.msra.gmra.mrb[0].mxu1 %vm128_vm2, %v110_v29 }
 0x1b4   :  { %v198_v35 = vpop.f32.mrb[0].mxu1 }
 0x1b5   :  { %v199_v36 = vadd.f32 %v306_v34, %v198_v35  ;;  %v360_v37 = vpop.f32.mrb[1].mxu1 }
 0x1b7   :  { %374 = vmatmul.mubr.msk.f32.vlgmr.msra.gmra.mrb[2].mxu0 %vm215_vm3, %v199_v36 }
 0x28a   :  { %v285_v39 = vpop.f32.mrb[2].mxu0 }
 0x28b   :  { %v286_v40 = vadd.f32 %v308_v38, %v285_v39  ;;  %v375_v41 = vpop.f32.mrb[3].mxu0 }
 0x28d   :  { %289 = vst [vmem:[#allocation2] sm:$0xff] %v286_v40 }
 0x28e   :  { %418 = shalt.err (!%p415_p4)
}
 0x28f   :  { %s419_s20 = scalar_lea.hbm %s563_s7, 128 }
 0x290   :  { %p420_p5 = scmp.ne.s32.totalorder %s563_s7, %s419_s20  ;;  %p423_p6 = scmp.lt.u32.totalorder %s419_s20, %s563_s7 }
 0x292   :  { %p425_p7 = pnand %p423_p6, %p420_p5 }
 0x294   :  { %428 = shalt.err (!%p425_p7)
}
 0x295   :  { %299 = dma.vmem_to_hbm [thread:$0]  %s297_s18, 128, %s563_s7, [#allocation3]  }
 0x296   :  { %429 = dma.done.wait [#allocation3], 128  }
 0x297   :  { %430 = vsyncadd [#allocation3], 4294967168 }
 0x298   :  { %303 = vsyncpa [#allocation3], 1 }

// kernel: tpu_custom_call.1
= control target key start
LH: loop header
LB: loop body
LE: loop exit
PB: predicated region body
PF: predicated region fallthrough
CT: control target
= control target key end

     0   :  { %v431_v3 = vmov 0.0|0.0   ;;  %vm432_vm0 = vmmov 0   ;;  %v433_v6 = vmov 0.0   ;;  %s556_s0 = inlined_call_operand.vmem [shape: f32[8,32], index: 0, kind: input, shape index: {}]   ;;  %s557_s1 = inlined_call_operand.vmem [shape: f32[32,64], index: 1, kind: input, shape index: {}]   ;;  %s558_s2 = inlined_call_operand.vmem [shape: f32[1,64], index: 2, kind: input, shape index: {}]   ;;  %s559_s3 = inlined_call_operand.vmem [shape: f32[64,48], index: 3, kind: input, shape index: {}]   ;;  %s560_s4 = inlined_call_operand.vmem [shape: f32[1,48], index: 4, kind: input, shape index: {}]   ;;  %s561_s5 = inlined_call_operand.vmem [shape: f32[48,128], index: 5, kind: input, shape index: {}]   ;;  %s562_s6 = inlined_call_operand.vmem [shape: f32[1,128], index: 6, kind: input, shape index: {}]   ;;  %s563_s7 = inlined_call_operand.hbm [shape: f32[8,128], index: 7, kind: output, shape index: {}]  }
   0x1   :  { %v28_v0 = vld [vmem:[%s557_s1] sm:$0xff]  ;;  %v29_v1 = vld [vmem:[%s557_s1 + $0x8] sm:$0xff]  ;;  %v30_v2 = vld [vmem:[%s557_s1 + $0x10] sm:$0xff]  ;;  %376 = vmatprep.subr.bf16.mxu0 %v431_v3  ;;  %339 = vmatprep.mubr.msk.f32.mxu0 %vm432_vm0, %v433_v6 }
   0x2   :  { %v377_v4 = vpack.c.bf16 %v29_v1, %v28_v0  ;;  %v31_v5 = vld [vmem:[%s557_s1 + $0x18] sm:$0xff]  ;;  %v113_v7 = vld [vmem:[%s559_s3] sm:$0xff]  ;;  %382 = vmatprep.subr.bf16.mxu1 %v431_v3  ;;  %v114_v8 = vld [vmem:[%s559_s3 + $0x8] sm:$0xff]  ;;  %358 = vmatprep.mubr.msk.f32.mxu1 %vm432_vm0, %v433_v6 }
   0x3   :  { %v115_v9 = vld [vmem:[%s559_s3 + $0x10] sm:$0xff]  ;;  %v116_v10 = vld [vmem:[%s559_s3 + $0x18] sm:$0xff]  ;;  %v380_v11 = vpack.c.bf16 %v31_v5, %v30_v2  ;;  %v383_v12 = vpack.c.bf16 %v114_v8, %v113_v7 }
   0x4   :  { %378 = vmatpush3.bf16.msra.mxu0 %v377_v4 }
   0x5   :  { %379 = vmatprep.subr.bf16.mxu0 %v431_v3 }
   0x6   :  { %12 = vsyncpa [#allocation3], 0  ;;  %384 = vmatpush3.bf16.msra.mxu1 %v383_v12  ;;  %v386_v13 = vpack.c.bf16 %v116_v10, %v115_v9  ;;  %v117_v14 = vld [vmem:[%s559_s3 + $0x20] sm:$0xff]  ;;  %v118_v15 = vld [vmem:[%s559_s3 + $0x28] sm:$0xff]  ;;  %vm39_vm1 = vcmask 261120   ;;  %vm128_vm2 = vcmask 523264  }
   0x7   :  { %385 = vmatprep.subr.bf16.mxu1 %v431_v3  ;;  %v27_v16 = vld [vmem:[%s556_s0] sm:$0xff]  ;;  %v389_v17 = vpack.c.bf16 %v118_v15, %v117_v14  ;;  %v119_v18 = vld [vmem:[%s559_s3 + $0x30] sm:$0xff]  ;;  %v120_v19 = vld [vmem:[%s559_s3 + $0x38] sm:$0xff]  ;;  %vm215_vm3 = vcmask 392192   ;;  %s434_s17 = smov [#allocation2]  }
   0x8   :  { %381 = vmatpush3.bf16.msra.mxu0 %v380_v11  ;;  %v392_v20 = vpack.c.bf16 %v120_v19, %v119_v18  ;;  %v202_v21 = vld [vmem:[%s561_s5] sm:$0xff]  ;;  %v203_v22 = vld [vmem:[%s561_s5 + $0x8] sm:$0xff]  ;;  %v204_v23 = vld [vmem:[%s561_s5 + $0x10] sm:$0xff]  ;;  %s296_s18 = sshll.u32 %s434_s17, 4  ;;  %s297_s18 = int_to_ptr.vmem [resolvable:$true] %s296_s18 }
   0x9   :  { %394 = vmatprep.subr.bf16.mxu0 %v431_v3  ;;  %v395_v24 = vpack.c.bf16 %v203_v22, %v202_v21  ;;  %v205_v25 = vld [vmem:[%s561_s5 + $0x18] sm:$0xff]  ;;  %v304_v27 = vld [vmem:[%s558_s2] ss:$0 sm:$0xff]  ;;  %v207_v32 = vld [vmem:[%s561_s5 + $0x28] sm:$0xff]  ;;  %p412_p1 = scmp.lt.s32.totalorder %s297_s18, %s297_s18 }
   0xa   :  { %387 = vmatpush3.bf16.msra.mxu1 %v386_v13  ;;  %v398_v26 = vpack.c.bf16 %v205_v25, %v204_v23  ;;  %v206_v31 = vld [vmem:[%s561_s5 + $0x20] sm:$0xff]  ;;  %s407_s5 = scalar_lea.vmem %s297_s18, 128 }
   0xb   :  { %340 = vmatmul.mubr.msk.f32.vlgmr.msra.gmra.mrb[0].mxu0 %vm39_vm1, %v27_v16  ;;  %388 = vmatprep.subr.bf16.mxu1 %v431_v3  ;;  %v401_v33 = vpack.c.bf16 %v207_v32, %v206_v31  ;;  %v306_v34 = vld [vmem:[%s560_s4] ss:$0 sm:$0xff]  ;;  %p408_p0 = scmp.ne.s32.totalorder %s297_s18, %s407_s5  ;;  %p413_p2 = scmp.lt.s32.totalorder %s407_s5, %s407_s5 }
   0xc   :  { %373 = vmatprep.mubr.msk.f32.mxu0 %vm432_vm0, %v433_v6  ;;  %396 = vmatpush3.bf16.msra.mxu0 %v395_v24  ;;  %v308_v38 = vld [vmem:[%s562_s6] ss:$0 sm:$0xff] }
   0xd   :  { %397 = vmatprep.subr.bf16.mxu0 %v431_v3  ;;  %p414_p3 = por %p413_p2, %p412_p1 }
   0xe   :  { %390 = vmatpush3.bf16.msra.mxu1 %v389_v17 }
   0xf   :  { %391 = vmatprep.subr.bf16.mxu1 %v431_v3  ;;  %p415_p4 = pnand %p414_p3, %p408_p0 }
  0x10   :  { %399 = vmatpush3.bf16.msra.mxu0 %v398_v26 }
  0x11   :  { %400 = vmatprep.subr.bf16.mxu0 %v431_v3 }
  0x12   :  { %393 = vmatpush3.bf16.msra.mxu1 %v392_v20 }
  0x14   :  { %402 = vmatpush3.bf16.msra.mxu0 %v401_v33 }
  0xde   :  { %v109_v28 = vpop.f32.mrb[0].mxu0 }
  0xdf   :  { %v110_v29 = vadd.f32 %v304_v27, %v109_v28  ;;  %v341_v30 = vpop.f32.mrb[1].mxu0 }
  0xe1   :  { %359 = vmatmul.mubr.msk.f32.vlgmr.msra.gmra.mrb[0].mxu1 %vm128_vm2, %v110_v29 }
 0x1b4   :  { %v198_v35 = vpop.f32.mrb[0].mxu1 }
 0x1b5   :  { %v199_v36 = vadd.f32 %v306_v34, %v198_v35  ;;  %v360_v37 = vpop.f32.mrb[1].mxu1 }
 0x1b7   :  { %374 = vmatmul.mubr.msk.f32.vlgmr.msra.gmra.mrb[2].mxu0 %vm215_vm3, %v199_v36 }
 0x28a   :  { %v285_v39 = vpop.f32.mrb[2].mxu0 }
 0x28b   :  { %v286_v40 = vadd.f32 %v308_v38, %v285_v39  ;;  %v375_v41 = vpop.f32.mrb[3].mxu0 }
 0x28d   :  { %289 = vst [vmem:[#allocation2] sm:$0xff] %v286_v40 }
 0x28e   :  { %418 = shalt.err (!%p415_p4)
}
 0x28f   :  { %s419_s20 = scalar_lea.hbm %s563_s7, 128 }
 0x290   :  { %p420_p5 = scmp.ne.s32.totalorder %s563_s7, %s419_s20  ;;  %p423_p6 = scmp.lt.u32.totalorder %s419_s20, %s563_s7 }
 0x292   :  { %p425_p7 = pnand %p423_p6, %p420_p5 }
 0x294   :  { %428 = shalt.err (!%p425_p7)
}
 0x295   :  { %299 = dma.vmem_to_hbm [thread:$0]  %s297_s18, 128, %s563_s7, [#allocation3]  }
 0x296   :  { %429 = dma.done.wait [#allocation3], 128  }
 0x297   :  { %430 = vsyncadd [#allocation3], 4294967168 }
 0x298   :  { %303 = vsyncpa [#allocation3], 1 }

</bundles_post_ra>
